<compile_context>
chip_gen: v7x
topology: tpu7x:2x2x1
jax: 0.10.0
libtpu: 0.0.40
codegen_flags: <defaults>
</compile_context>

<pallas_src>
import math
import functools

import jax
import jax.numpy as jnp
from jax.experimental import pallas as pl
from jax.experimental.pallas import tpu as pltpu


def _sage_kernel(src_ref, nbrf_ref, w_self_ref, w_nbf_ref, out_ref):
    """One tile of nodes: two MXU dots into one f32 accumulator, add, relu."""
    # Dominant, lane-dense matmul: [tile, K*D] @ [K*D, H] (mean folded into
    # the weight). Operands stay in their compute dtype; accumulate in f32.
    acc = jnp.dot(nbrf_ref[...], w_nbf_ref[...],
                  preferred_element_type=jnp.float32)
    # Small self-term matmul: [tile, D] @ [D, H], added in f32.
    acc = acc + jnp.dot(src_ref[...], w_self_ref[...],
                        preferred_element_type=jnp.float32)
    # 'sum' combine already done; relu in f32, cast only at the store.
    out_ref[...] = jnp.maximum(acc, 0.0).astype(out_ref.dtype)


def _round_up(x, m):
    return (x + m - 1) // m * m


@functools.partial(jax.jit, static_argnames=("tile_n", "compute_dtype"))
def sage_gcn_forward(src, nbr, w_self, w_nb, *, tile_n=2048,
                     compute_dtype=jnp.bfloat16):
    """src: [N, D], nbr: [N, K, D], w_self/w_nb: [D, H] -> [N, H]."""
    N, D = src.shape
    _, K, _ = nbr.shape
    H = w_self.shape[1]
    KD = K * D
    out_dtype = src.dtype

    # (1) Fold the neighbor mean into the weight (in f32, then cast):
    #     mean_k(nbr[i,k,:]) @ W_nb == nbr_flat[i,:] @ (tile(W_nb, K) / K).
    w_nb_fold = jnp.tile(w_nb.astype(jnp.float32), (K, 1)) / float(K)

    # (2) Cast the streamed operands to the compute dtype (bf16 by default):
    #     the kernel is HBM-read bound on the [N, K*D] stream, so halving the
    #     input bytes is ~2x at the memory roofline. Accumulation stays f32.
    src_c = src.astype(compute_dtype)
    nbr_flat = nbr.reshape(N, KD).astype(compute_dtype)
    w_self_c = w_self.astype(compute_dtype)
    w_nbf_c = w_nb_fold.astype(compute_dtype)

    # (3) Node-axis tiling: big tiles (amortize ~0.35us/step), rounded to the
    #     sublane packing of the compute dtype, capped so the grid keeps >=4
    #     steps when N allows (2 TensorCores on v7x, >=2 steps each for
    #     pipeline overlap). No row padding: Pallas masks the ragged tail.
    min_tile = 8 if jnp.dtype(compute_dtype).itemsize == 4 else 16
    tile_req = max(min_tile, _round_up(int(tile_n), min_tile))
    tile_cap = max(min_tile, _round_up(pl.cdiv(N, 4), min_tile))
    tile = min(tile_req, tile_cap)
    grid = (pl.cdiv(N, tile),)

    in_bytes = jnp.dtype(compute_dtype).itemsize
    out_bytes = jnp.dtype(out_dtype).itemsize
    cost = pl.CostEstimate(
        flops=2 * N * (KD + D) * H,
        transcendentals=0,
        bytes_accessed=(N * (D + KD) * in_bytes
                        + (D + KD) * H * in_bytes
                        + N * H * out_bytes),
    )

    out = pl.pallas_call(
        _sage_kernel,
        out_shape=jax.ShapeDtypeStruct((N, H), out_dtype),
        grid_spec=pltpu.PrefetchScalarGridSpec(
            num_scalar_prefetch=0,
            grid=grid,
            in_specs=[
                pl.BlockSpec((tile, D), lambda i: (i, 0)),    # src tile
                pl.BlockSpec((tile, KD), lambda i: (i, 0)),   # flat nbr tile
                pl.BlockSpec((D, H), lambda i: (0, 0)),       # W_self (resident)
                pl.BlockSpec((KD, H), lambda i: (0, 0)),      # folded W_nb (resident)
            ],
            out_specs=pl.BlockSpec((tile, H), lambda i: (i, 0)),
        ),
        compiler_params=pltpu.CompilerParams(
            dimension_semantics=("parallel",),
            # Explicit scoped-VMEM budget; safe on v5e/v6e (128 MiB physical)
            # and equals the default cap on v7x (64 MiB physical).
            vmem_limit_bytes=32 * 1024 * 1024,
        ),
        cost_estimate=cost,
    )(src_c, nbr_flat, w_self_c, w_nbf_c)

    return out


def kaiming_uniform(key, shape):
    """Deterministic stand-in for torch init.kaiming_uniform_ (fan_in mode)."""
    fan_in = shape[0]
    bound = math.sqrt(6.0 / fan_in)
    return jax.random.uniform(key, shape, dtype=jnp.float32,
                              minval=-bound, maxval=bound)


def sage_gcn_reference(src, nbr, w_self, w_nb):
    aggr = jnp.mean(nbr, axis=1)
    hidden = src @ w_self + aggr @ w_nb
    return jnp.maximum(hidden, 0.0)


if __name__ == "__main__":
    # Small shapes: N nodes, K neighbors per node, D input feat dim, H hidden dim.
    N, K, D, H = 128, 8, 16, 32

    key = jax.random.PRNGKey(0)
    k_src, k_nbr, k_ws, k_wn = jax.random.split(key, 4)

    src = jax.random.normal(k_src, (N, D), dtype=jnp.float32)
    nbr = jax.random.normal(k_nbr, (N, K, D), dtype=jnp.float32)

    # Parameter init matching the module's __init__ shapes:
    #   SageGCN.weight            : [input_dim, hidden_dim]
    #   NeighborAggregator.weight : [input_dim, hidden_dim]
    w_self = kaiming_uniform(k_ws, (D, H))
    w_nb = kaiming_uniform(k_wn, (D, H))

    ref = sage_gcn_reference(src, nbr, w_self, w_nb)

    # f32 compute path: tight check against the reference.
    out_f32 = jax.block_until_ready(
        sage_gcn_forward(src, nbr, w_self, w_nb, compute_dtype=jnp.float32))
    assert out_f32.shape == (N, H)
    assert jnp.allclose(out_f32, ref, atol=1e-4, rtol=1e-4), "f32 mismatch"

    # Default bf16 compute path (f32 accumulation): looser tolerance from
    # bf16 input rounding.
    out_bf = jax.block_until_ready(sage_gcn_forward(src, nbr, w_self, w_nb))
    assert out_bf.shape == (N, H)
    assert out_bf.dtype == src.dtype
    assert jnp.allclose(out_bf, ref, atol=5e-2, rtol=5e-2), "bf16 mismatch"

    # Ragged last block: N not a multiple of the node tile (exercises Pallas
    # masking of the partial final block instead of jnp.pad).
    N2 = 100
    out_r = jax.block_until_ready(
        sage_gcn_forward(src[:N2], nbr[:N2], w_self, w_nb))
    assert out_r.shape == (N2, H)
    assert jnp.allclose(out_r, ref[:N2], atol=5e-2, rtol=5e-2), "ragged mismatch"

    print("KERNEL_OK")
</pallas_src>

<mosaic_0001>
module attributes {stable_mosaic.version = 11 : i64} {
  func.func @_sage_kernel(%arg0: i32, %arg1: memref<32x16xf32, #tpu.memory_space<vmem>>, %arg2: memref<32x128xf32, #tpu.memory_space<vmem>>, %arg3: memref<16x32xf32, #tpu.memory_space<vmem>>, %arg4: memref<128x32xf32, #tpu.memory_space<vmem>>, %arg5: memref<32x32xf32, #tpu.memory_space<vmem>>) attributes {dimension_semantics = [#tpu.dimension_semantics<parallel>], iteration_bounds = array<i64: 4>, scalar_prefetch = 0 : i64, scratch_operands = 0 : i64, tpu.core_type = #tpu.core_type<tc>, window_params = [{transform_indices = @transform_0, window_bounds = array<i64: 32, 16>}, {transform_indices = @transform_1, window_bounds = array<i64: 32, 128>}, {pipeline_mode = #tpu.pipeline_mode<synchronous>, transform_indices = @transform_2, window_bounds = array<i64: 16, 32>}, {pipeline_mode = #tpu.pipeline_mode<synchronous>, transform_indices = @transform_3, window_bounds = array<i64: 128, 32>}, {transform_indices = @transform_4, window_bounds = array<i64: 32, 32>}]} {
    %c0 = arith.constant 0 : index
    %c0_0 = arith.constant 0 : index
    %0 = vector.load %arg2[%c0, %c0_0] : memref<32x128xf32, #tpu.memory_space<vmem>>, vector<32x128xf32>
    %c0_1 = arith.constant 0 : index
    %c0_2 = arith.constant 0 : index
    %1 = vector.load %arg4[%c0_1, %c0_2] : memref<128x32xf32, #tpu.memory_space<vmem>>, vector<128x32xf32>
    %cst = arith.constant dense<0.000000e+00> : vector<32x32xf32>
    %2 = tpu.matmul %0, %1, %cst {dimension_numbers = #tpu.dot_dimension_numbers<[1], [0], [0], [1], [0, 0, 1, 1], [], []>} : vector<32x128xf32>, vector<128x32xf32>, vector<32x32xf32> -> vector<32x32xf32>
    %c0_3 = arith.constant 0 : index
    %c0_4 = arith.constant 0 : index
    %3 = vector.load %arg1[%c0_3, %c0_4] : memref<32x16xf32, #tpu.memory_space<vmem>>, vector<32x16xf32>
    %c0_5 = arith.constant 0 : index
    %c0_6 = arith.constant 0 : index
    %4 = vector.load %arg3[%c0_5, %c0_6] : memref<16x32xf32, #tpu.memory_space<vmem>>, vector<16x32xf32>
    %cst_7 = arith.constant dense<0.000000e+00> : vector<32x32xf32>
    %5 = tpu.matmul %3, %4, %cst_7 {dimension_numbers = #tpu.dot_dimension_numbers<[1], [0], [0], [1], [0, 0, 1, 1], [], []>} : vector<32x16xf32>, vector<16x32xf32>, vector<32x32xf32> -> vector<32x32xf32>
    %6 = arith.addf %2, %5 : vector<32x32xf32>
    %cst_8 = arith.constant 0.000000e+00 : f32
    %7 = vector.broadcast %cst_8 : f32 to vector<32x32xf32>
    %8 = arith.maximumf %6, %7 : vector<32x32xf32>
    %c0_9 = arith.constant 0 : index
    %c0_10 = arith.constant 0 : index
    %9 = vector.load %arg5[%c0_9, %c0_10] : memref<32x32xf32, #tpu.memory_space<vmem>>, vector<32x32xf32>
    tpu.vector_store %arg5[%c0_9, %c0_10], %8 {strides = array<i32>} : memref<32x32xf32, #tpu.memory_space<vmem>>, vector<32x32xf32>,
    return
  }
  func.func @transform_0(%arg0: i32) -> (i32, i32) {
    %c0_i32 = arith.constant 0 : i32
    %c0_i32_0 = arith.constant 0 : i32
    return %arg0, %c0_i32 : i32, i32
  }
  func.func @transform_1(%arg0: i32) -> (i32, i32) {
    %c0_i32 = arith.constant 0 : i32
    %c0_i32_0 = arith.constant 0 : i32
    return %arg0, %c0_i32 : i32, i32
  }
  func.func @transform_2(%arg0: i32) -> (i32, i32) {
    %c0_i32 = arith.constant 0 : i32
    %c0_i32_0 = arith.constant 0 : i32
    %c0_i32_1 = arith.constant 0 : i32
    return %c0_i32, %c0_i32_0 : i32, i32
  }
  func.func @transform_3(%arg0: i32) -> (i32, i32) {
    %c0_i32 = arith.constant 0 : i32
    %c0_i32_0 = arith.constant 0 : i32
    %c0_i32_1 = arith.constant 0 : i32
    return %c0_i32, %c0_i32_0 : i32, i32
  }
  func.func @transform_4(%arg0: i32) -> (i32, i32) {
    %c0_i32 = arith.constant 0 : i32
    %c0_i32_0 = arith.constant 0 : i32
    return %arg0, %c0_i32 : i32, i32
  }
}

</mosaic_0001>

<bundles_post_ra>
// kernel: sage_gcn_forward.1
= control target key start
LH: loop header
LB: loop body
LE: loop exit
PB: predicated region body
PF: predicated region fallthrough
CT: control target
= control target key end

     0   :  { %s681_s15 = smov 0   ;;  %s770_s0 = inlined_call_operand.vmem [shape: f32[128,16], index: 0, kind: input, shape index: {}]   ;;  %s771_s1 = inlined_call_operand.vmem [shape: f32[128,128], index: 1, kind: input, shape index: {}]   ;;  %s772_s2 = inlined_call_operand.vmem [shape: f32[16,32], index: 2, kind: input, shape index: {}]   ;;  %s773_s3 = inlined_call_operand.vmem [shape: f32[128,32], index: 3, kind: input, shape index: {}]   ;;  %s774_s4 = inlined_call_operand.vmem [shape: f32[128,32], index: 4, kind: output, shape index: {}]  }
   0x1 LB: > { %s509_s16 = sadd.s32 4294967295, %s654_s15   ;;  %p513_p0 = scmp.ge.s32.totalorder %s654_s15, 1  ;;  %s654_s15 = sphi %s681_s15, %s14_s15  }
   0x2   : > { %p174_p1 = scmp.lt.s32.totalorder %s654_s15, 5 }
   0x4   : > { %p175_p2 = pnand %p513_p0, %p174_p1 }
   0x5   : > { %v227_v0 = vld [vmem:[%s773_s3] sm:$0xff] (!%p175_p2)  ;;  %v228_v1 = vld [vmem:[%s773_s3 + $0x8] sm:$0xff] (!%p175_p2)  ;;  %v229_v2 = vld [vmem:[%s773_s3 + $0x10] sm:$0xff] (!%p175_p2)  ;;  %s514_s23 = sshll.u32 (!%p175_p2), %s509_s16, 2  ;;  %vm249_vm0 = vcmask (!%p175_p2), 130048   ;;  %vm436_vm1 = vcmask (!%p175_p2), 261120  }
   0x6   : > { %178 = sbr.rel (%p175_p2) target bundleno = 262 (0x106), region = 36  ;;  %v604_v3 = vpack.c.bf16 (!%p175_p2), %v228_v1, %v227_v0  ;;  %v230_v4 = vld [vmem:[%s773_s3 + $0x18] sm:$0xff] (!%p175_p2)  ;;  %p206_p3 = scmp.lt.s32.totalorder (!%p175_p2), %s514_s23, 15  ;;  %v231_v6 = vld [vmem:[%s773_s3 + $0x20] sm:$0xff] (!%p175_p2)  ;;  %v232_v7 = vld [vmem:[%s773_s3 + $0x28] sm:$0xff] (!%p175_p2) }
   0x7   : > { %v608_v5 = vpack.c.bf16 (!%p175_p2), %v230_v4, %v229_v2  ;;  %v247_v8 = vld [vmem:[%s772_s2] sm:$0xff] (!%p175_p2)  ;;  %v612_v9 = vpack.c.bf16 (!%p175_p2), %v232_v7, %v231_v6  ;;  %v248_v10 = vld [vmem:[%s772_s2 + $0x8] sm:$0xff] (!%p175_p2)  ;;  %v233_v11 = vld [vmem:[%s773_s3 + $0x30] sm:$0xff] (!%p175_p2) }
   0x8   : > { %605 = vmatprep.subr.bf16.mxu0 (!%p175_p2), %v604_v3  ;;  %v234_v12 = vld [vmem:[%s773_s3 + $0x38] sm:$0xff] (!%p175_p2)  ;;  %v600_v13 = vpack.c.bf16 (!%p175_p2), %v248_v10, %v247_v8  ;;  %v235_v18 = vld [vmem:[%s773_s3 + $0x40] sm:$0xff] (!%p175_p2)  ;;  %v236_v19 = vld [vmem:[%s773_s3 + $0x48] sm:$0xff] (!%p175_p2) }
   0x9   : > { %607 = vmatpush3.bf16.msra.mxu0 (!%p175_p2), %v604_v3  ;;  %v616_v16 = vpack.c.bf16 (!%p175_p2), %v234_v12, %v233_v11  ;;  %v620_v21 = vpack.c.bf16 (!%p175_p2), %v236_v19, %v235_v18  ;;  %v237_v23 = vld [vmem:[%s773_s3 + $0x50] sm:$0xff] (!%p175_p2)  ;;  %v238_v24 = vld [vmem:[%s773_s3 + $0x58] sm:$0xff] (!%p175_p2)  ;;  %v239_v26 = vld [vmem:[%s773_s3 + $0x60] sm:$0xff] (!%p175_p2) }
   0xa   : > { %609 = vmatprep.subr.bf16.mxu0 (!%p175_p2), %v608_v5  ;;  %601 = vmatprep.subr.bf16.mxu1 (!%p175_p2), %v600_v13  ;;  %v624_v25 = vpack.c.bf16 (!%p175_p2), %v238_v24, %v237_v23  ;;  %v240_v27 = vld [vmem:[%s773_s3 + $0x68] sm:$0xff] (!%p175_p2)  ;;  %v241_v29 = vld [vmem:[%s773_s3 + $0x70] sm:$0xff] (!%p175_p2)  ;;  %v242_v30 = vld [vmem:[%s773_s3 + $0x78] sm:$0xff] (!%p175_p2) }
   0xb   : > { %603 = vmatpush3.bf16.msra.mxu1 (!%p175_p2), %v600_v13  ;;  %v628_v28 = vpack.c.bf16 (!%p175_p2), %v240_v27, %v239_v26  ;;  %v632_v31 = vpack.c.bf16 (!%p175_p2), %v242_v30, %v241_v29 }
   0xd   : > { %s776_s23 = smov (!%p206_p3, %s514_s23), 15  ;;  %611 = vmatpush3.bf16.msra.mxu0 %v608_v5 }
   0xe   : > { %s713_s8 = sshll.u32 %s776_s23, 3  ;;  %613 = vmatprep.subr.bf16.mxu0 %v612_v9 }
   0xf   : > { %s209_s16 = scalar_lea.vmem %s770_s0, %s713_s8  ;;  %s729_s19 = scalar_lea.vmem %s771_s1, %s713_s8 }
  0x10   : > { %v243_v14 = vld [vmem:[%s209_s16] sm:$0xff]  ;;  %v244_v17 = vld [vmem:[%s209_s16 + $0x8] sm:$0xff]  ;;  %v245_v20 = vld [vmem:[%s209_s16 + $0x10] sm:$0xff]  ;;  %s221_s13 = scalar_lea.vmem %s774_s4, %s713_s8 }
  0x11   : > { %v223_v15 = vld [vmem:[%s729_s19] sm:$0xff]  ;;  %556 = vmatprep.mubr.msk.f32.mxu1 %vm249_vm0, %v243_v14  ;;  %615 = vmatpush3.bf16.msra.mxu0 %v612_v9  ;;  %v246_v22 = vld [vmem:[%s209_s16 + $0x18] sm:$0xff]  ;;  %v224_v32 = vld [vmem:[%s729_s19 + $0x8] sm:$0xff] }
  0x12   : > { %594 = vmatprep.mubr.f32.mxu0 %v223_v15  ;;  %557 = vmatmul.mubr.msk.f32.vlgmr.msra.gmra.mrb[0].mxu1 %vm249_vm0, %v244_v17  ;;  %v225_v33 = vld [vmem:[%s729_s19 + $0x10] sm:$0xff]  ;;  %v226_v34 = vld [vmem:[%s729_s19 + $0x18] sm:$0xff] }
  0x13   : > { %617 = vmatprep.subr.bf16.mxu0 %v616_v16  ;;  %559 = vmatprep.mubr.msk.f32.mxu1 %vm249_vm0, %v245_v20 }
  0x15   : > { %619 = vmatpush3.bf16.msra.mxu0 %v616_v16 }
  0x16   : > { %560 = vmatmul.mubr.msk.f32.gmra.mrb[2].mxu1 %vm249_vm0, %v246_v22  ;;  %621 = vmatprep.subr.bf16.mxu0 %v620_v21 }
  0x19   : > { %623 = vmatpush3.bf16.msra.mxu0 %v620_v21 }
  0x1a   : > { %625 = vmatprep.subr.bf16.mxu0 %v624_v25 }
  0x1d   : > { %627 = vmatpush3.bf16.msra.mxu0 %v624_v25 }
  0x1e   : > { %629 = vmatprep.subr.bf16.mxu0 %v628_v28 }
  0x21   : > { %631 = vmatpush3.bf16.msra.mxu0 %v628_v28 }
  0x22   : > { %633 = vmatprep.subr.bf16.mxu0 %v632_v31 }
  0x25   : > { %635 = vmatpush3.bf16.msra.mxu0 %v632_v31 }
  0x28   : > { %595 = vmatmul.mubr.f32.vlgmr.msra.gmra.mrb[0].mxu0 %v224_v32 }
  0x29   : > { %597 = vmatprep.mubr.f32.mxu0 %v225_v33 }
  0x2c   : > { %598 = vmatmul.mubr.f32.gmra.mrb[2].mxu0 %v226_v34 }
  0xe5   : > { %v558_v35 = vpop.f32.mrb[0].mxu1 }
  0xe6   : > { %v328_v36 = vpop.f32.mrb[1].mxu1 }
  0xe9   : > { %v561_v37 = vpop.f32.mrb[2].mxu1 }
  0xea   : > { %v338_v38 = vpop.f32.mrb[3].mxu1 }
  0xfb   : > { %v596_v39 = vpop.f32.mrb[0].mxu0 }
  0xfc   : > { %v419_v40 = vadd.f32 %v596_v39, %v558_v35  ;;  %v413_v41 = vpop.f32.mrb[1].mxu0 }
  0xfd   : > { %v414_v42 = vadd.f32 %v413_v41, %v328_v36 }
  0xfe   : > { %v433_v43 = vmax.f32 %v419_v40, 0.0 }
  0xff   : > { %v432_v44 = vmax.f32 %v414_v42, 0.0  ;;  %v599_v45 = vpop.f32.mrb[2].mxu0 }
 0x100   : > { %438 = vst.msk [vmem:[%s221_s13 + $0x8] sm:$0xff] %vm436_vm1, %v433_v43  ;;  %v429_v46 = vadd.f32 %v599_v45, %v561_v37  ;;  %v423_v47 = vpop.f32.mrb[3].mxu0 }
 0x101   : > { %437 = vst.msk [vmem:[%s221_s13] sm:$0xff] %vm436_vm1, %v432_v44  ;;  %v424_v48 = vadd.f32 %v423_v47, %v338_v38 }
 0x102   : > { %v435_v49 = vmax.f32 %v429_v46, 0.0 }
 0x103   : > { %v434_v50 = vmax.f32 %v424_v48, 0.0 }
 0x104   : > { %440 = vst.msk [vmem:[%s221_s13 + $0x18] sm:$0xff] %vm436_vm1, %v435_v49 }
 0x105   : > { %439 = vst.msk [vmem:[%s221_s13 + $0x10] sm:$0xff] %vm436_vm1, %v434_v50 }
 0x106 PF: > { %s14_s15 = sadd.s32 1, %s654_s15  }
 0x107   : > { %p11_p4 = scmp.ge.s32.totalorder %s14_s15, 6  }
 0x109   :  { %13 = sbr.rel (!%p11_p4) target bundleno = 1 (0x1), region = 69 }

</bundles_post_ra>
